<compile_context>
chip_gen: v7x
topology: tpu7x:2x2x1
jax: 0.10.0
libtpu: 0.0.40
codegen_flags: <defaults>
</compile_context>

<pallas_src>
import jax
import jax.numpy as jnp
from jax.experimental import pallas as pl
from jax.experimental.pallas import tpu as pltpu

HIDDEN_DIM = 50
EMBED_DIM = 100
NUM_CLASS = 4


def _round_up(v, m):
    return ((v + m - 1) // m) * m


def _network_kernel(x_ref, w1_ref, b1_ref, w2t_ref, b2t_ref, out_ref):
    # linear1: cast x to bf16 in-register (no extra HBM pass), MXU matmul with
    # f32 accumulation; bias + ReLU in f32.
    x = x_ref[...].astype(jnp.bfloat16)
    h = jnp.dot(x, w1_ref[...], preferred_element_type=jnp.float32)
    h = jnp.maximum(h + b1_ref[...], 0.0)                       # (tb, hp) f32

    # TODO(synk): nn.Dropout(p=0.2) is identity in eval mode; training-mode
    # stochastic masking (pltpu.prng_random_bits) is intentionally omitted.

    # linear2 in transposed (class-major) layout, f32:
    #   (num_class, hp) . (tb, hp)^T  ->  (num_class, tb)
    logits_t = jax.lax.dot_general(
        w2t_ref[...], h,
        dimension_numbers=(((1,), (1,)), ((), ())),
        preferred_element_type=jnp.float32) + b2t_ref[...]       # (C, tb)

    # softmax over the class axis (PyTorch dim=1 == axis 0 here). Lane-dense:
    # per-column reductions over 4 sublanes; exact divide (cheap in this
    # layout, rows sum to 1 to f32 precision).  A padded (garbage) last batch
    # tile is safe: those columns are never written back.
    m = jnp.max(logits_t, axis=0, keepdims=True)                 # (1, tb)
    e = jnp.exp(logits_t - m)                                    # (C, tb)
    denom = jnp.sum(e, axis=0, keepdims=True)                    # (1, tb)
    out_ref[...] = (e / denom).astype(out_ref.dtype)


def prepare_params(w1, b1, w2, b2):
    """One-time parameter prep (hoisted out of the per-call hot path).

    Inputs are in (in, out) layout (i.e. PyTorch weight.T).  The hidden dim is
    zero-padded 50 -> 128 so the resident weight tiles and the h intermediate
    are lane-dense; padded w1 columns / b1 entries are zero (so padded h cols
    are exactly 0 after ReLU) and padded w2 columns are zero (logits unchanged).
    w2/b2 are stored transposed (class-major) for the lane-dense epilogue.
    """
    embed, hidden = w1.shape
    num_class = w2.shape[1]
    hp = max(128, _round_up(hidden, 128))

    w1p = jnp.zeros((embed, hp), jnp.bfloat16).at[:, :hidden].set(
        w1.astype(jnp.bfloat16))
    b1p = jnp.zeros((1, hp), jnp.float32).at[:, :hidden].set(
        b1.reshape(1, hidden).astype(jnp.float32))
    w2t = jnp.zeros((num_class, hp), jnp.float32).at[:, :hidden].set(
        w2.astype(jnp.float32).T)
    b2t = b2.reshape(num_class, 1).astype(jnp.float32)
    return w1p, b1p, w2t, b2t


def _pick_tile(B, block_b):
    """Batch tile: tiny batches -> one full-extent block; large batches ->
    lane-aligned (multiple of 128) tiles with >= 2 grid steps so v7x can shard
    the batch axis over both TensorCores (no-op on single-TC v5e/v6e)."""
    if B <= 256:
        return B
    return min(block_b, _round_up(pl.cdiv(B, 2), 128))


def network_forward(x, w1p, b1p, w2t, b2t, *, block_b=2048):
    """x: (B, EMBED_DIM) f32 (native, un-cast).  Params from prepare_params().
    Returns softmax probs (B, num_class) f32."""
    B, embed = x.shape
    hp = w1p.shape[1]
    num_class = w2t.shape[0]

    tb = _pick_tile(B, block_b)
    grid = (pl.cdiv(B, tb),)

    cost = pl.CostEstimate(
        flops=2 * B * (embed * hp + hp * num_class),
        transcendentals=B * num_class,                      # exp per logit
        bytes_accessed=(B * embed * 4                       # f32 x stream
                        + embed * hp * 2 + hp * 4           # w1 (bf16) + b1
                        + hp * num_class * 4 + num_class * 4  # w2t + b2t
                        + B * num_class * 4),                # output
    )

    out_t = pl.pallas_call(
        _network_kernel,
        out_shape=jax.ShapeDtypeStruct((num_class, B), jnp.float32),
        grid=grid,
        in_specs=[
            pl.BlockSpec((tb, embed), lambda i: (i, 0)),          # x stream (f32)
            pl.BlockSpec((embed, hp), lambda i: (0, 0)),          # w1 resident
            pl.BlockSpec((1, hp), lambda i: (0, 0)),              # b1 resident
            pl.BlockSpec((num_class, hp), lambda i: (0, 0)),      # w2^T resident
            pl.BlockSpec((num_class, 1), lambda i: (0, 0)),       # b2^T resident
        ],
        out_specs=pl.BlockSpec((num_class, tb), lambda i: (0, i)),  # lane-dense
        compiler_params=pltpu.CompilerParams(
            dimension_semantics=("parallel",)),
        cost_estimate=cost,
    )(x, w1p, b1p, w2t, b2t)

    return out_t.T   # (B, num_class); tiny (4, B) transpose in the wrapper


def init_params(key, num_class=NUM_CLASS):
    """Deterministic synthetic parameters (shapes match the nn.Module)."""
    k1, k2, k3, k4 = jax.random.split(key, 4)
    # Stored as (in, out); equivalent to PyTorch weight.T
    w1 = jax.random.normal(k1, (EMBED_DIM, HIDDEN_DIM), jnp.float32) * 0.1
    b1 = jax.random.normal(k2, (1, HIDDEN_DIM), jnp.float32) * 0.1
    w2 = jax.random.normal(k3, (HIDDEN_DIM, num_class), jnp.float32) * 0.1
    b2 = jax.random.normal(k4, (1, num_class), jnp.float32) * 0.1
    return w1, b1, w2, b2


def _reference(x, w1, b1, w2, b2):
    h = jnp.maximum(x @ w1 + b1, 0.0)
    logits = h @ w2 + b2
    return jax.nn.softmax(logits, axis=1)


if __name__ == "__main__":
    key = jax.random.PRNGKey(0)
    kx, kp = jax.random.split(key)

    B = 8
    x = jax.random.normal(kx, (B, EMBED_DIM), jnp.float32)
    w1, b1, w2, b2 = init_params(kp, NUM_CLASS)

    params = prepare_params(w1, b1, w2, b2)       # one-time prep (off hot path)
    fwd = jax.jit(network_forward)
    out = fwd(x, *params)
    jax.block_until_ready(out)

    ref = _reference(x, w1, b1, w2, b2)
    assert out.shape == (B, NUM_CLASS)
    # bf16 first matmul -> compare to f32 reference with a loosened (but still
    # tight for softmax probabilities) tolerance.
    max_err = float(jnp.max(jnp.abs(out - ref)))
    assert max_err < 2e-2, max_err
    # exact divide -> rows sum to 1 to f32 precision
    assert jnp.allclose(jnp.sum(out, axis=1), jnp.ones((B,)), atol=1e-3)

    print("KERNEL_OK")
</pallas_src>

<mosaic_0001>
module attributes {stable_mosaic.version = 11 : i64} {
  func.func @_network_kernel(%arg0: i32, %arg1: memref<8x100xf32, #tpu.memory_space<vmem>>, %arg2: memref<100x128xbf16, #tpu.memory_space<vmem>>, %arg3: memref<1x128xf32, #tpu.memory_space<vmem>>, %arg4: memref<4x128xf32, #tpu.memory_space<vmem>>, %arg5: memref<4x1xf32, #tpu.memory_space<vmem>>, %arg6: memref<4x8xf32, #tpu.memory_space<vmem>>) attributes {dimension_semantics = [#tpu.dimension_semantics<parallel>], iteration_bounds = array<i64: 1>, scalar_prefetch = 0 : i64, scratch_operands = 0 : i64, tpu.core_type = #tpu.core_type<tc>, window_params = [{transform_indices = @transform_0, window_bounds = array<i64: 8, 100>}, {pipeline_mode = #tpu.pipeline_mode<synchronous>, transform_indices = @transform_1, window_bounds = array<i64: 100, 128>}, {pipeline_mode = #tpu.pipeline_mode<synchronous>, transform_indices = @transform_2, window_bounds = array<i64: 1, 128>}, {pipeline_mode = #tpu.pipeline_mode<synchronous>, transform_indices = @transform_3, window_bounds = array<i64: 4, 128>}, {pipeline_mode = #tpu.pipeline_mode<synchronous>, transform_indices = @transform_4, window_bounds = array<i64: 4, 1>}, {transform_indices = @transform_5, window_bounds = array<i64: 4, 8>}]} {
    %c0 = arith.constant 0 : index
    %c0_0 = arith.constant 0 : index
    %0 = vector.load %arg1[%c0, %c0_0] : memref<8x100xf32, #tpu.memory_space<vmem>>, vector<8x100xf32>
    %1 = arith.truncf %0 : vector<8x100xf32> to vector<8x100xbf16>
    %c0_1 = arith.constant 0 : index
    %c0_2 = arith.constant 0 : index
    %2 = vector.load %arg2[%c0_1, %c0_2] : memref<100x128xbf16, #tpu.memory_space<vmem>>, vector<100x128xbf16>
    %cst = arith.constant dense<0.000000e+00> : vector<8x128xf32>
    %3 = tpu.matmul %1, %2, %cst {dimension_numbers = #tpu.dot_dimension_numbers<[1], [0], [0], [1], [0, 0, 1, 1], [], []>} : vector<8x100xbf16>, vector<100x128xbf16>, vector<8x128xf32> -> vector<8x128xf32>
    %c0_3 = arith.constant 0 : index
    %c0_4 = arith.constant 0 : index
    %4 = vector.load %arg3[%c0_3, %c0_4] : memref<1x128xf32, #tpu.memory_space<vmem>>, vector<1x128xf32>
    %5 = vector.broadcast %4 : vector<1x128xf32> to vector<8x128xf32>
    %6 = arith.addf %3, %5 : vector<8x128xf32>
    %cst_5 = arith.constant 0.000000e+00 : f32
    %7 = vector.broadcast %cst_5 : f32 to vector<8x128xf32>
    %8 = arith.maximumf %6, %7 : vector<8x128xf32>
    %c0_6 = arith.constant 0 : index
    %c0_7 = arith.constant 0 : index
    %9 = vector.load %arg4[%c0_6, %c0_7] : memref<4x128xf32, #tpu.memory_space<vmem>>, vector<4x128xf32>
    %cst_8 = arith.constant dense<0.000000e+00> : vector<4x8xf32>
    %10 = tpu.matmul %9, %8, %cst_8 {dimension_numbers = #tpu.dot_dimension_numbers<[1], [1], [0], [0], [0, 0, 1, 0], [], []>} : vector<4x128xf32>, vector<8x128xf32>, vector<4x8xf32> -> vector<4x8xf32>
    %c0_9 = arith.constant 0 : index
    %c0_10 = arith.constant 0 : index
    %11 = vector.load %arg5[%c0_9, %c0_10] : memref<4x1xf32, #tpu.memory_space<vmem>>, vector<4x1xf32>
    %12 = vector.broadcast %11 : vector<4x1xf32> to vector<4x8xf32>
    %13 = arith.addf %10, %12 : vector<4x8xf32>
    %cst_11 = arith.constant dense<0xFF800000> : vector<8xf32>
    %14 = vector.multi_reduction <maximumf>, %13, %cst_11 [0] : vector<4x8xf32> to vector<8xf32>
    %15 = vector.shape_cast %14 : vector<8xf32> to vector<1x8xf32>
    %16 = vector.broadcast %15 : vector<1x8xf32> to vector<4x8xf32>
    %17 = arith.subf %13, %16 : vector<4x8xf32>
    %18 = math.exp %17 : vector<4x8xf32>
    %cst_12 = arith.constant dense<0.000000e+00> : vector<8xf32>
    %19 = vector.multi_reduction <add>, %18, %cst_12 [0] : vector<4x8xf32> to vector<8xf32>
    %20 = vector.shape_cast %19 : vector<8xf32> to vector<1x8xf32>
    %21 = vector.broadcast %20 : vector<1x8xf32> to vector<4x8xf32>
    %22 = arith.divf %18, %21 : vector<4x8xf32>
    %c0_13 = arith.constant 0 : index
    %c0_14 = arith.constant 0 : index
    %23 = vector.load %arg6[%c0_13, %c0_14] : memref<4x8xf32, #tpu.memory_space<vmem>>, vector<4x8xf32>
    tpu.vector_store %arg6[%c0_13, %c0_14], %22 {strides = array<i32>} : memref<4x8xf32, #tpu.memory_space<vmem>>, vector<4x8xf32>,
    return
  }
  func.func @transform_0(%arg0: i32) -> (i32, i32) {
    %c0_i32 = arith.constant 0 : i32
    %c0_i32_0 = arith.constant 0 : i32
    return %arg0, %c0_i32 : i32, i32
  }
  func.func @transform_1(%arg0: i32) -> (i32, i32) {
    %c0_i32 = arith.constant 0 : i32
    %c0_i32_0 = arith.constant 0 : i32
    %c0_i32_1 = arith.constant 0 : i32
    return %c0_i32, %c0_i32_0 : i32, i32
  }
  func.func @transform_2(%arg0: i32) -> (i32, i32) {
    %c0_i32 = arith.constant 0 : i32
    %c0_i32_0 = arith.constant 0 : i32
    %c0_i32_1 = arith.constant 0 : i32
    return %c0_i32, %c0_i32_0 : i32, i32
  }
  func.func @transform_3(%arg0: i32) -> (i32, i32) {
    %c0_i32 = arith.constant 0 : i32
    %c0_i32_0 = arith.constant 0 : i32
    %c0_i32_1 = arith.constant 0 : i32
    return %c0_i32, %c0_i32_0 : i32, i32
  }
  func.func @transform_4(%arg0: i32) -> (i32, i32) {
    %c0_i32 = arith.constant 0 : i32
    %c0_i32_0 = arith.constant 0 : i32
    %c0_i32_1 = arith.constant 0 : i32
    return %c0_i32, %c0_i32_0 : i32, i32
  }
  func.func @transform_5(%arg0: i32) -> (i32, i32) {
    %c0_i32 = arith.constant 0 : i32
    %c0_i32_0 = arith.constant 0 : i32
    return %c0_i32, %arg0 : i32, i32
  }
}

</mosaic_0001>

<bundles_post_ra>
// kernel: network_forward.1
= control target key start
LH: loop header
LB: loop body
LE: loop exit
PB: predicated region body
PF: predicated region fallthrough
CT: control target
= control target key end

     0   :  { %10 = vsyncpa [#allocation3], 0  ;;  %s499_s0 = inlined_call_operand.hbm [shape: f32[8,100], index: 0, kind: input, shape index: {}]   ;;  %s500_s1 = inlined_call_operand.hbm [shape: bf16[100,128], index: 1, kind: input, shape index: {}]   ;;  %s501_s2 = inlined_call_operand.vmem [shape: f32[1,128], index: 2, kind: input, shape index: {}]   ;;  %s502_s3 = inlined_call_operand.vmem [shape: f32[4,128], index: 3, kind: input, shape index: {}]   ;;  %s503_s4 = inlined_call_operand.vmem [shape: f32[4,1], index: 4, kind: input, shape index: {}]   ;;  %s504_s5 = inlined_call_operand.hbm [shape: f32[4,8], index: 5, kind: output, shape index: {}]  }
   0x1   :  { %11 = vsyncpa [#allocation6], 0 }
   0x2   :  { %12 = vsyncpa [#allocation4], 0  ;;  %s406_s18 = smov [#allocation2]   ;;  %s407_s20 = smov [#allocation5]  }
   0x3   :  { %s19_s19 = sshll.u32 %s406_s18, 4  ;;  %s28_s21 = sshll.u32 %s407_s20, 4  ;;  %s20_s19 = int_to_ptr.vmem [resolvable:$true] %s19_s19  ;;  %s444_s21 = int_to_ptr.vmem [resolvable:$true] %s28_s21 }
   0x4   :  { %s334_s24 = scalar_lea.hbm %s499_s0, 128 }
   0x5   :  { %p335_p0 = scmp.ne.s32.totalorder %s499_s0, %s334_s24  ;;  %p338_p1 = scmp.lt.u32.totalorder %s334_s24, %s499_s0 }
   0x7   :  { %p340_p2 = pnand %p338_p1, %p335_p0 }
   0x9   :  { %343 = shalt.err (!%p340_p2)
}
   0xa   :  { %s344_s29 = scalar_lea.vmem %s20_s19, 128  ;;  %p349_p4 = scmp.lt.s32.totalorder %s20_s19, %s20_s19 }
   0xb   :  { %p345_p3 = scmp.ne.s32.totalorder %s20_s19, %s344_s29  ;;  %p350_p5 = scmp.lt.s32.totalorder %s344_s29, %s344_s29 }
   0xd   :  { %p351_p6 = por %p350_p5, %p349_p4 }
   0xf   :  { %p352_p7 = pnand %p351_p6, %p345_p3 }
  0x11   :  { %355 = shalt.err (!%p352_p7)
}
  0x12   :  { %22 = dma.hbm_to_vmem [thread:$0]  %s499_s0, 128, %s20_s19, [#allocation3]  }
  0x13   :  { %s356_s9 = scalar_lea.hbm %s500_s1, 832 }
  0x14   :  { %p357_p8 = scmp.ne.s32.totalorder %s500_s1, %s356_s9  ;;  %p360_p9 = scmp.lt.u32.totalorder %s356_s9, %s500_s1 }
  0x16   :  { %p362_p10 = pnand %p360_p9, %p357_p8 }
  0x18   :  { %365 = shalt.err (!%p362_p10)
}
  0x19   :  { %s366_s14 = scalar_lea.vmem %s444_s21, 832  ;;  %p371_p12 = scmp.lt.s32.totalorder %s444_s21, %s444_s21 }
  0x1a   :  { %p367_p11 = scmp.ne.s32.totalorder %s444_s21, %s366_s14  ;;  %p372_p13 = scmp.lt.s32.totalorder %s366_s14, %s366_s14 }
  0x1c   :  { %p373_p0 = por %p372_p13, %p371_p12 }
  0x1e   :  { %p374_p1 = pnand %p373_p0, %p367_p11 }
  0x20   :  { %377 = shalt.err (!%p374_p1)
}
  0x21   :  { %s408_s0 = smov 64   ;;  %s409_s15 = smov 4  }
  0x22   :  { %34 = dma.hbm_to_vmem [thread:$0]  %s500_s1, 832, %s444_s21, [#allocation6], %s408_s0, %s408_s0, %s409_s15  }
  0x23   :  { %400 = dma.done.wait [#allocation3], 128  }
  0x24   :  { %401 = vsyncadd [#allocation3], 4294967168 }
  0x25   :  { %402 = dma.done.wait [#allocation6], 832  }
  0x26   :  { %403 = vsyncadd [#allocation6], 4294966464  ;;  %v410_v0 = vmov 0.0   ;;  %vm411_vm0 = vmmov 0   ;;  %v323_v1 = vld [vmem:[#allocation5] sm:$0xff]   ;;  %v324_v2 = vld [vmem:[#allocation5 + $0x8] sm:$0xff]  }
  0x27   :  { %291 = vmatprep.subr.bf16.mxu0 %v410_v0  ;;  %305 = vmatprep.mubr.msk.bf16.mxu0 %vm411_vm0, %v410_v0  ;;  %v325_v3 = vld [vmem:[#allocation5 + $0x10] sm:$0xff]   ;;  %v326_v4 = vld [vmem:[#allocation5 + $0x18] sm:$0xff]   ;;  %v327_v5 = vld [vmem:[#allocation5 + $0x20] sm:$0xff]   ;;  %vm113_vm1 = vcmask 1041408   ;;  %vm109_vm2 = vcmask 818176   ;;  %v412_v12 = vmov 0  }
  0x28   :  { %309 = vmatprep.subr.mxu1 %v410_v0  ;;  %311 = vmatprep.mubr.msk.f32.mxu1 %vm411_vm0, %v410_v0  ;;  %v328_v6 = vld [vmem:[#allocation5 + $0x28] sm:$0xff]   ;;  %v329_v7 = vld [vmem:[#allocation5 + $0x30] ss:$0 sps:$4 sm:$0x33]   ;;  %v48_v8 = vld [vmem:[#allocation2] sm:$0xff]  ;;  %vm235_vm3 = vcmask 60416  }
  0x29   :  { %292 = vmatpush3.bf16.msra.mxu0 %v323_v1  ;;  %v115_v9 = vsel %vm113_vm1, %v329_v7, 0  ;;  %v49_v10 = vpack.c.bf16 %v48_v8, %v48_v8  ;;  %v159_v11 = vld [vmem:[%s503_s4] sm:$0xf]  ;;  %322 = vset.pattern.permute.xlu0 %v412_v12 }
  0x2a   :  { %293 = vmatprep.subr.bf16.mxu0 %v410_v0  ;;  %162 = vperm.xlu0 %322, %v159_v11   ;;  %v272_v13 = vld [vmem:[%s501_s2] ss:$0 sm:$0xff]  ;;  %s413_s2 = smov [#allocation7]  }
  0x2b   :  { %v158_v20 = vld [vmem:[%s502_s3] sm:$0xf]  ;;  %s262_s3 = sshll.u32 %s413_s2, 4  ;;  %s263_s3 = int_to_ptr.vmem [resolvable:$true] %s262_s3 }
  0x2c   :  { %s378_s4 = scalar_lea.vmem %s263_s3, 64  ;;  %p383_p3 = scmp.lt.s32.totalorder %s263_s3, %s263_s3 }
  0x2d   :  { %294 = vmatpush3.bf16.msra.mxu0 %v324_v2  ;;  %p379_p2 = scmp.ne.s32.totalorder %s263_s3, %s378_s4  ;;  %p384_p4 = scmp.lt.s32.totalorder %s378_s4, %s378_s4 }
  0x2e   :  { %295 = vmatprep.subr.bf16.mxu0 %v410_v0 }
  0x2f   :  { %p385_p5 = por %p384_p4, %p383_p3 }
  0x31   :  { %296 = vmatpush3.bf16.msra.mxu0 %v325_v3  ;;  %p386_p6 = pnand %p385_p5, %p379_p2 }
  0x32   :  { %297 = vmatprep.subr.bf16.mxu0 %v410_v0 }
  0x35   :  { %298 = vmatpush3.bf16.msra.mxu0 %v326_v4 }
  0x36   :  { %299 = vmatprep.subr.bf16.mxu0 %v410_v0 }
  0x39   :  { %300 = vmatpush3.bf16.msra.mxu0 %v327_v5 }
  0x3a   :  { %301 = vmatprep.subr.bf16.mxu0 %v410_v0 }
  0x3d   :  { %302 = vmatpush3.bf16.msra.mxu0 %v328_v6 }
  0x3e   :  { %303 = vmatprep.subr.bf16.mxu0 %v410_v0 }
  0x41   :  { %304 = vmatpush3.bf16.msra.mxu0 %v115_v9 }
  0x44   :  { %306 = vmatmul.mubr.msk.bf16.vlgmr.msra.gmra.mrb[0].mxu0 %vm109_vm2, %v49_v10 }
  0xa9   :  { %v163_v21 = vpop.permute.xlu0 %162 }
 0x117   :  { %v151_v14 = vpop.f32.mrb[0].mxu0 }
 0x118   :  { %v152_v15 = vadd.f32 %v272_v13, %v151_v14  ;;  %v307_v16 = vpop.f32.mrb[1].mxu0 }
 0x119   :  { %v154_v17 = vpop.f32.mrb[2].mxu0 }
 0x11a   :  { %v157_v18 = vmax.f32 %v152_v15, 0.0  ;;  %v308_v19 = vpop.f32.mrb[3].mxu0 }
 0x11c   :  { %310 = vmatpush3.xpose.msra.mxu1 %v157_v18 }
 0x11f   :  { %312 = vmatmul.mubr.f32.vlgmr.msra.gmra.mrb[0].mxu1 %v158_v20 }
 0x1f2   :  { %v231_v22 = vpop.f32.mrb[0].mxu1 }
 0x1f3   :  { %v232_v23 = vadd.f32 %v231_v22, %v163_v21  ;;  %v313_v24 = vpop.f32.mrb[1].mxu1 }
 0x1f5   :  { %v236_v25 = vsel %vm235_vm3, %v232_v23, -inf }
 0x1f6   :  { %v237_v26 = vrot.slane %v236_v25, 4 }
 0x1f8   :  { %v238_v27 = vmax.f32 %v236_v25, %v237_v26 }
 0x1fa   :  { %v239_v28 = vrot.slane %v238_v27, 2 }
 0x1fc   :  { %v240_v29 = vmax.f32 %v238_v27, %v239_v28 }
 0x1fe   :  { %v241_v30 = vrot.slane %v240_v29, 1 }
 0x200   :  { %v242_v31 = vmax.f32 %v240_v29, %v241_v30 }
 0x202   :  { %v243_v32 = vsub.f32 %v232_v23, %v242_v31 }
 0x204   :  { %v244_v33 = vmul.f32 1.442695, %v243_v32 }
 0x206   :  { %330 = vpow2.f32 %v244_v33 }
 0x210   :  { %v331_v34 = vpop.eup %330 }
 0x211   :  { %v246_v35 = vsel %vm235_vm3, %v331_v34, 0.0 }
 0x212   :  { %v247_v36 = vrot.slane %v246_v35, 4 }
 0x214   :  { %v248_v37 = vadd.f32 %v247_v36, %v246_v35 }
 0x216   :  { %v249_v38 = vrot.slane %v248_v37, 2 }
 0x218   :  { %v250_v39 = vadd.f32 %v249_v38, %v248_v37 }
 0x21a   :  { %v251_v40 = vrot.slane %v250_v39, 1 }
 0x21c   :  { %v252_v41 = vadd.f32 %v251_v40, %v250_v39 }
 0x21e   :  { %332 = vrcp.f32 %v252_v41 }
 0x228   :  { %v333_v42 = vpop.eup %332 }
 0x229   :  { %v254_v43 = vmul.f32 %v333_v42, %v331_v34 }
 0x22b   :  { %255 = vst.msk [vmem:[#allocation7] sm:$0xf] %vm235_vm3, %v254_v43 }
 0x22c   :  { %389 = shalt.err (!%p386_p6)
}
 0x22d   :  { %s390_s25 = scalar_lea.hbm %s504_s5, 64 }
 0x22e   :  { %p391_p7 = scmp.ne.s32.totalorder %s504_s5, %s390_s25  ;;  %p394_p8 = scmp.lt.u32.totalorder %s390_s25, %s504_s5 }
 0x230   :  { %p396_p9 = pnand %p394_p8, %p391_p7 }
 0x232   :  { %399 = shalt.err (!%p396_p9)
}
 0x233   :  { %265 = dma.vmem_to_hbm [thread:$0]  %s263_s3, 64, %s504_s5, [#allocation4]  }
 0x234   :  { %404 = dma.done.wait [#allocation4], 64  }
 0x235   :  { %405 = vsyncadd [#allocation4], 4294967232 }
 0x236   :  { %269 = vsyncpa [#allocation3], 1 }
 0x237   :  { %270 = vsyncpa [#allocation6], 1 }
 0x238   :  { %271 = vsyncpa [#allocation4], 1 }

</bundles_post_ra>
